<compile_context>
chip_gen: v7x
topology: tpu7x:2x2x1
jax: 0.10.0
libtpu: 0.0.40
codegen_flags: <defaults>
</compile_context>

<pallas_src>
import functools

import jax
import jax.numpy as jnp
from jax.experimental import pallas as pl
from jax.experimental.pallas import tpu as pltpu


def _wavenet_kernel(dilations,
                    x_ref, wc_ref, wd_ref, wrs_ref, brs_ref,
                    w1_ref, b1_ref, w2_ref, b2_ref, out_ref):
    """Whole WaveNet forward for one batch element (grid axis = batch).

    Activations live in fixed [channels, Tpad] buffers whose valid region is
    right-aligned; each layer's valid length shrinks by its dilation exactly like
    the PyTorch module, but all shapes stay static and 128-lane aligned.
    """
    f32, bf16 = jnp.float32, jnp.bfloat16

    x = x_ref[0]                          # [Cin, Tpad] f32 (left zero-padded)
    Cin, Tpad = x.shape
    Cres = wd_ref.shape[1]

    # ---- CausalConv1d (kernel=2, no bias): both taps fused in one MXU matmul ----
    x_prev = pltpu.roll(x, 1, 1)                               # x[t-1] at column t
    xx = jnp.concatenate([x_prev, x], axis=0).astype(bf16)     # [2*Cin, Tpad]
    h = jnp.dot(wc_ref[...], xx, preferred_element_type=f32)   # [Cres, Tpad]

    skip_sum = jnp.zeros((Cin, Tpad), f32)

    # ---- ResidualStack (unrolled; dilations are static) -------------------------
    for i, d in enumerate(dilations):
        h_prev = pltpu.roll(h, d, 1)                               # h[t-d] at column t
        hh = jnp.concatenate([h_prev, h], axis=0).astype(bf16)     # [2*Cres, Tpad]
        pre = jnp.dot(wd_ref[i], hh, preferred_element_type=f32)   # [Cres, Tpad]
        gated = jnp.tanh(pre) * jax.nn.sigmoid(pre)                # f32 on VPU/EUP
        # conv_res and conv_skip fused into one matmul, rows split afterwards.
        rs = jnp.dot(wrs_ref[i], gated.astype(bf16),
                     preferred_element_type=f32) + brs_ref[i]      # [Cres+Cin, Tpad]
        h = rs[:Cres] + h          # residual add == input_cut (right-aligned)
        skip_sum = skip_sum + rs[Cres:]   # only last skip_size lanes are ever used

    # ---- DensNet: relu -> 1x1 conv -> relu -> 1x1 conv -> softmax over channels --
    y = jnp.maximum(skip_sum, 0.0)
    y = jnp.dot(w1_ref[...], y.astype(bf16), preferred_element_type=f32) + b1_ref[...]
    y = jnp.maximum(y, 0.0)
    y = jnp.dot(w2_ref[...], y.astype(bf16), preferred_element_type=f32) + b2_ref[...]
    y = y - jnp.max(y, axis=0, keepdims=True)
    e = jnp.exp(y)
    y = e * pl.reciprocal(jnp.sum(e, axis=0, keepdims=True), approx=False)

    out_ref[0] = y.astype(out_ref.dtype)


def wavenet_forward(x_nct, params, dilations):
    """x_nct: [B, Cin, T] (PyTorch layout). Returns [B, Cin, output_size]."""
    B, Cin, T = x_nct.shape
    receptive = sum(dilations)
    skip_size = T - receptive - 1
    assert skip_size >= 1, "Input size has to be larger than receptive_fields"

    f32, bf16 = jnp.float32, jnp.bfloat16

    # Right-align time on a 128-lane-aligned buffer (left zero padding).
    Tpad = ((T + 127) // 128) * 128
    x_pad = jnp.pad(x_nct.astype(f32), ((0, 0), (0, 0), (Tpad - T, 0)))

    # Pack weights for the kernel: bf16 MXU operands, f32 biases.
    wc = params["w_causal"]                                 # [Cres, Cin, 2]
    wc_cat = jnp.concatenate([wc[:, :, 0], wc[:, :, 1]], axis=1).astype(bf16)
    wd = params["w_dil"]                                    # [NB, Cres, Cres, 2]
    wd_cat = jnp.concatenate([wd[..., 0], wd[..., 1]], axis=2).astype(bf16)
    wrs_cat = jnp.concatenate([params["w_res"], params["w_skip"]], axis=1).astype(bf16)
    brs_cat = jnp.concatenate([params["b_res"], params["b_skip"]],
                              axis=1)[:, :, None].astype(f32)
    w1 = params["w_dens1"].astype(bf16)
    b1 = params["b_dens1"][:, None].astype(f32)
    w2 = params["w_dens2"].astype(bf16)
    b2 = params["b_dens2"][:, None].astype(f32)

    kernel = functools.partial(_wavenet_kernel, tuple(dilations))

    in_specs = [
        pl.BlockSpec((1, Cin, Tpad), lambda b: (b, 0, 0)),   # x, one batch element
        pl.BlockSpec(wc_cat.shape, lambda b: (0, 0)),        # fused causal weight
        pl.BlockSpec(wd_cat.shape, lambda b: (0, 0, 0)),     # fused dilated weights
        pl.BlockSpec(wrs_cat.shape, lambda b: (0, 0, 0)),    # fused res+skip weights
        pl.BlockSpec(brs_cat.shape, lambda b: (0, 0, 0)),    # fused res+skip biases
        pl.BlockSpec(w1.shape, lambda b: (0, 0)),
        pl.BlockSpec(b1.shape, lambda b: (0, 0)),
        pl.BlockSpec(w2.shape, lambda b: (0, 0)),
        pl.BlockSpec(b2.shape, lambda b: (0, 0)),
    ]
    out_specs = pl.BlockSpec((1, Cin, Tpad), lambda b: (b, 0, 0))

    # NOTE: for production WaveNet sizes (T in the thousands, Cres 64-512), add a
    # time-tile grid axis with a max(dilations) halo so the working set fits the
    # 64 MiB VMEM of v7x instead of keeping the whole sequence resident.
    out_pad = pl.pallas_call(
        kernel,
        out_shape=jax.ShapeDtypeStruct((B, Cin, Tpad), jnp.float32),
        grid=(B,),
        in_specs=in_specs,
        out_specs=out_specs,
        compiler_params=pltpu.CompilerParams(
            dimension_semantics=("parallel",),         # megacore: batch across TCs
            vmem_limit_bytes=48 * 1024 * 1024),
    )(x_pad, wc_cat, wd_cat, wrs_cat, brs_cat, w1, b1, w2, b2)

    # Valid output = last skip_size time steps (already in NCT layout).
    return out_pad[:, :, Tpad - skip_size:]


def wavenet_reference(x_nct, params, dilations):
    """Pure-JAX reference mirroring the PyTorch forward (slice-based, no padding).

    Matmul inputs are cast to bf16 with f32 accumulation to match the kernel's
    MXU precision policy; all other math is f32.
    """
    bf16, f32 = jnp.bfloat16, jnp.float32

    def mm(w, a):   # w: [c_out, c_in], a: [B, c_in, L]
        return jnp.einsum('oc,bcl->bol', w.astype(bf16), a.astype(bf16),
                          preferred_element_type=f32)

    x = x_nct.astype(f32)
    B, Cin, T = x.shape
    skip_size = T - sum(dilations) - 1

    wc = params["w_causal"]
    h = mm(wc[:, :, 0], x[:, :, :T - 1]) + mm(wc[:, :, 1], x[:, :, 1:])
    L = T - 1
    skip_sum = 0.0
    for i, d in enumerate(dilations):
        wd = params["w_dil"][i]
        pre = mm(wd[:, :, 0], h[:, :, :L - d]) + mm(wd[:, :, 1], h[:, :, d:])
        gated = jnp.tanh(pre) * jax.nn.sigmoid(pre)
        res = mm(params["w_res"][i], gated) + params["b_res"][i][None, :, None] + h[:, :, d:]
        skip = mm(params["w_skip"][i], gated) + params["b_skip"][i][None, :, None]
        skip_sum = skip_sum + skip[:, :, -skip_size:]
        h = res
        L = L - d
    y = jax.nn.relu(skip_sum)
    y = mm(params["w_dens1"], y) + params["b_dens1"][None, :, None]
    y = jax.nn.relu(y)
    y = mm(params["w_dens2"], y) + params["b_dens2"][None, :, None]
    return jax.nn.softmax(y, axis=1)


if __name__ == "__main__":
    # Small, WaveNet-consistent shapes (weights stored in torch Conv1d layout).
    B, Cin, Cres = 2, 4, 8
    layer_size, stack_size = 3, 2
    dilations = [2 ** l for _ in range(stack_size) for l in range(layer_size)]  # rf = 14
    T = 24                                                                       # output_size = 9
    NB = len(dilations)

    key = jax.random.PRNGKey(0)
    ks = jax.random.split(key, 11)
    s = 0.25
    params = {
        "w_causal": jax.random.normal(ks[0], (Cres, Cin, 2), jnp.float32) * s,
        "w_dil":    jax.random.normal(ks[1], (NB, Cres, Cres, 2), jnp.float32) * s,
        "w_res":    jax.random.normal(ks[2], (NB, Cres, Cres), jnp.float32) * s,
        "b_res":    jax.random.normal(ks[3], (NB, Cres), jnp.float32) * s,
        "w_skip":   jax.random.normal(ks[4], (NB, Cin, Cres), jnp.float32) * s,
        "b_skip":   jax.random.normal(ks[5], (NB, Cin), jnp.float32) * s,
        "w_dens1":  jax.random.normal(ks[6], (Cin, Cin), jnp.float32) * s,
        "b_dens1":  jax.random.normal(ks[7], (Cin,), jnp.float32) * s,
        "w_dens2":  jax.random.normal(ks[8], (Cin, Cin), jnp.float32) * s,
        "b_dens2":  jax.random.normal(ks[9], (Cin,), jnp.float32) * s,
    }
    x = jax.random.normal(ks[10], (B, Cin, T), jnp.float32)

    out = jax.block_until_ready(wavenet_forward(x, params, dilations))
    ref = wavenet_reference(x, params, dilations)

    assert out.shape == (B, Cin, T - sum(dilations) - 1), out.shape
    max_err = float(jnp.max(jnp.abs(out - ref)))
    assert jnp.allclose(out, ref, atol=2e-3, rtol=2e-3), max_err

    print("KERNEL_OK")
</pallas_src>

<mosaic_0001>
module attributes {stable_mosaic.version = 11 : i64} {
  func.func @_wavenet_kernel(%arg0: i32, %arg1: memref<1x4x128xf32, #tpu.memory_space<vmem>>, %arg2: memref<8x8xbf16, #tpu.memory_space<vmem>>, %arg3: memref<6x8x16xbf16, #tpu.memory_space<vmem>>, %arg4: memref<6x12x8xbf16, #tpu.memory_space<vmem>>, %arg5: memref<6x12x1xf32, #tpu.memory_space<vmem>>, %arg6: memref<4x4xbf16, #tpu.memory_space<vmem>>, %arg7: memref<4x1xf32, #tpu.memory_space<vmem>>, %arg8: memref<4x4xbf16, #tpu.memory_space<vmem>>, %arg9: memref<4x1xf32, #tpu.memory_space<vmem>>, %arg10: memref<1x4x128xf32, #tpu.memory_space<vmem>>) attributes {dimension_semantics = [#tpu.dimension_semantics<parallel>], iteration_bounds = array<i64: 2>, scalar_prefetch = 0 : i64, scratch_operands = 0 : i64, tpu.core_type = #tpu.core_type<tc>, window_params = [{transform_indices = @transform_0, window_bounds = array<i64: 1, 4, 128>}, {pipeline_mode = #tpu.pipeline_mode<synchronous>, transform_indices = @transform_1, window_bounds = array<i64: 8, 8>}, {pipeline_mode = #tpu.pipeline_mode<synchronous>, transform_indices = @transform_2, window_bounds = array<i64: 6, 8, 16>}, {pipeline_mode = #tpu.pipeline_mode<synchronous>, transform_indices = @transform_3, window_bounds = array<i64: 6, 12, 8>}, {pipeline_mode = #tpu.pipeline_mode<synchronous>, transform_indices = @transform_4, window_bounds = array<i64: 6, 12, 1>}, {pipeline_mode = #tpu.pipeline_mode<synchronous>, transform_indices = @transform_5, window_bounds = array<i64: 4, 4>}, {pipeline_mode = #tpu.pipeline_mode<synchronous>, transform_indices = @transform_6, window_bounds = array<i64: 4, 1>}, {pipeline_mode = #tpu.pipeline_mode<synchronous>, transform_indices = @transform_7, window_bounds = array<i64: 4, 4>}, {pipeline_mode = #tpu.pipeline_mode<synchronous>, transform_indices = @transform_8, window_bounds = array<i64: 4, 1>}, {transform_indices = @transform_9, window_bounds = array<i64: 1, 4, 128>}]} {
    %c0 = arith.constant 0 : index
    %c0_0 = arith.constant 0 : index
    %c0_1 = arith.constant 0 : index
    %0 = vector.load %arg1[%c0, %c0_0, %c0_1] : memref<1x4x128xf32, #tpu.memory_space<vmem>>, vector<1x4x128xf32>
    %1 = vector.shape_cast %0 : vector<1x4x128xf32> to vector<4x128xf32>
    %c1_i32 = arith.constant 1 : i32
    %2 = tpu.dynamic_rotate %1 by %c1_i32 dim 1 : vector<4x128xf32>, i32 -> vector<4x128xf32>
    %3 = tpu.concatenate %2, %1 in 0 : vector<4x128xf32>, vector<4x128xf32> -> vector<8x128xf32>
    %4 = arith.truncf %3 : vector<8x128xf32> to vector<8x128xbf16>
    %c0_2 = arith.constant 0 : index
    %c0_3 = arith.constant 0 : index
    %5 = vector.load %arg2[%c0_2, %c0_3] : memref<8x8xbf16, #tpu.memory_space<vmem>>, vector<8x8xbf16>
    %cst = arith.constant dense<0.000000e+00> : vector<8x128xf32>
    %6 = tpu.matmul %5, %4, %cst {dimension_numbers = #tpu.dot_dimension_numbers<[1], [0], [0], [1], [0, 0, 1, 1], [], []>} : vector<8x8xbf16>, vector<8x128xbf16>, vector<8x128xf32> -> vector<8x128xf32>
    %cst_4 = arith.constant 0.000000e+00 : f32
    %7 = vector.broadcast %cst_4 : f32 to vector<4x128xf32>
    %c1_i32_5 = arith.constant 1 : i32
    %8 = tpu.dynamic_rotate %6 by %c1_i32_5 dim 1 : vector<8x128xf32>, i32 -> vector<8x128xf32>
    %9 = tpu.concatenate %8, %6 in 0 : vector<8x128xf32>, vector<8x128xf32> -> vector<16x128xf32>
    %10 = arith.truncf %9 : vector<16x128xf32> to vector<16x128xbf16>
    %c0_6 = arith.constant 0 : index
    %c0_7 = arith.constant 0 : index
    %c0_8 = arith.constant 0 : index
    %11 = vector.load %arg3[%c0_6, %c0_7, %c0_8] : memref<6x8x16xbf16, #tpu.memory_space<vmem>>, vector<1x8x16xbf16>
    %12 = vector.shape_cast %11 : vector<1x8x16xbf16> to vector<8x16xbf16>
    %cst_9 = arith.constant dense<0.000000e+00> : vector<8x128xf32>
    %13 = tpu.matmul %12, %10, %cst_9 {dimension_numbers = #tpu.dot_dimension_numbers<[1], [0], [0], [1], [0, 0, 1, 1], [], []>} : vector<8x16xbf16>, vector<16x128xbf16>, vector<8x128xf32> -> vector<8x128xf32>
    %14 = math.tanh %13 : vector<8x128xf32>
    %15 = arith.negf %13 : vector<8x128xf32>
    %16 = math.exp %15 : vector<8x128xf32>
    %cst_10 = arith.constant 1.000000e+00 : f32
    %17 = vector.broadcast %cst_10 : f32 to vector<8x128xf32>
    %18 = arith.addf %17, %16 : vector<8x128xf32>
    %19 = arith.divf %17, %18 : vector<8x128xf32>
    %20 = arith.mulf %14, %19 : vector<8x128xf32>
    %c0_11 = arith.constant 0 : index
    %c0_12 = arith.constant 0 : index
    %c0_13 = arith.constant 0 : index
    %21 = vector.load %arg4[%c0_11, %c0_12, %c0_13] : memref<6x12x8xbf16, #tpu.memory_space<vmem>>, vector<1x12x8xbf16>
    %22 = vector.shape_cast %21 : vector<1x12x8xbf16> to vector<12x8xbf16>
    %23 = arith.truncf %20 : vector<8x128xf32> to vector<8x128xbf16>
    %cst_14 = arith.constant dense<0.000000e+00> : vector<12x128xf32>
    %24 = tpu.matmul %22, %23, %cst_14 {dimension_numbers = #tpu.dot_dimension_numbers<[1], [0], [0], [1], [0, 0, 1, 1], [], []>} : vector<12x8xbf16>, vector<8x128xbf16>, vector<12x128xf32> -> vector<12x128xf32>
    %c0_15 = arith.constant 0 : index
    %c0_16 = arith.constant 0 : index
    %c0_17 = arith.constant 0 : index
    %25 = vector.load %arg5[%c0_15, %c0_16, %c0_17] : memref<6x12x1xf32, #tpu.memory_space<vmem>>, vector<1x12x1xf32>
    %26 = vector.shape_cast %25 : vector<1x12x1xf32> to vector<12x1xf32>
    %27 = vector.broadcast %26 : vector<12x1xf32> to vector<12x128xf32>
    %28 = arith.addf %24, %27 : vector<12x128xf32>
    %29 = vector.extract_strided_slice %28 {offsets = [0, 0], sizes = [8, 128], strides = [1, 1]} : vector<12x128xf32> to vector<8x128xf32>
    %30 = arith.addf %29, %6 : vector<8x128xf32>
    %31 = vector.extract_strided_slice %28 {offsets = [8, 0], sizes = [4, 128], strides = [1, 1]} : vector<12x128xf32> to vector<4x128xf32>
    %32 = arith.addf %7, %31 : vector<4x128xf32>
    %c2_i32 = arith.constant 2 : i32
    %33 = tpu.dynamic_rotate %30 by %c2_i32 dim 1 : vector<8x128xf32>, i32 -> vector<8x128xf32>
    %34 = tpu.concatenate %33, %30 in 0 : vector<8x128xf32>, vector<8x128xf32> -> vector<16x128xf32>
    %35 = arith.truncf %34 : vector<16x128xf32> to vector<16x128xbf16>
    %c1 = arith.constant 1 : index
    %c0_18 = arith.constant 0 : index
    %c0_19 = arith.constant 0 : index
    %36 = vector.load %arg3[%c1, %c0_18, %c0_19] : memref<6x8x16xbf16, #tpu.memory_space<vmem>>, vector<1x8x16xbf16>
    %37 = vector.shape_cast %36 : vector<1x8x16xbf16> to vector<8x16xbf16>
    %cst_20 = arith.constant dense<0.000000e+00> : vector<8x128xf32>
    %38 = tpu.matmul %37, %35, %cst_20 {dimension_numbers = #tpu.dot_dimension_numbers<[1], [0], [0], [1], [0, 0, 1, 1], [], []>} : vector<8x16xbf16>, vector<16x128xbf16>, vector<8x128xf32> -> vector<8x128xf32>
    %39 = math.tanh %38 : vector<8x128xf32>
    %40 = arith.negf %38 : vector<8x128xf32>
    %41 = math.exp %40 : vector<8x128xf32>
    %cst_21 = arith.constant 1.000000e+00 : f32
    %42 = vector.broadcast %cst_21 : f32 to vector<8x128xf32>
    %43 = arith.addf %42, %41 : vector<8x128xf32>
    %44 = arith.divf %42, %43 : vector<8x128xf32>
    %45 = arith.mulf %39, %44 : vector<8x128xf32>
    %c1_22 = arith.constant 1 : index
    %c0_23 = arith.constant 0 : index
    %c0_24 = arith.constant 0 : index
    %46 = vector.load %arg4[%c1_22, %c0_23, %c0_24] : memref<6x12x8xbf16, #tpu.memory_space<vmem>>, vector<1x12x8xbf16>
    %47 = vector.shape_cast %46 : vector<1x12x8xbf16> to vector<12x8xbf16>
    %48 = arith.truncf %45 : vector<8x128xf32> to vector<8x128xbf16>
    %cst_25 = arith.constant dense<0.000000e+00> : vector<12x128xf32>
    %49 = tpu.matmul %47, %48, %cst_25 {dimension_numbers = #tpu.dot_dimension_numbers<[1], [0], [0], [1], [0, 0, 1, 1], [], []>} : vector<12x8xbf16>, vector<8x128xbf16>, vector<12x128xf32> -> vector<12x128xf32>
    %c1_26 = arith.constant 1 : index
    %c0_27 = arith.constant 0 : index
    %c0_28 = arith.constant 0 : index
    %50 = vector.load %arg5[%c1_26, %c0_27, %c0_28] : memref<6x12x1xf32, #tpu.memory_space<vmem>>, vector<1x12x1xf32>
    %51 = vector.shape_cast %50 : vector<1x12x1xf32> to vector<12x1xf32>
    %52 = vector.broadcast %51 : vector<12x1xf32> to vector<12x128xf32>
    %53 = arith.addf %49, %52 : vector<12x128xf32>
    %54 = vector.extract_strided_slice %53 {offsets = [0, 0], sizes = [8, 128], strides = [1, 1]} : vector<12x128xf32> to vector<8x128xf32>
    %55 = arith.addf %54, %30 : vector<8x128xf32>
    %56 = vector.extract_strided_slice %53 {offsets = [8, 0], sizes = [4, 128], strides = [1, 1]} : vector<12x128xf32> to vector<4x128xf32>
    %57 = arith.addf %32, %56 : vector<4x128xf32>
    %c4_i32 = arith.constant 4 : i32
    %58 = tpu.dynamic_rotate %55 by %c4_i32 dim 1 : vector<8x128xf32>, i32 -> vector<8x128xf32>
    %59 = tpu.concatenate %58, %55 in 0 : vector<8x128xf32>, vector<8x128xf32> -> vector<16x128xf32>
    %60 = arith.truncf %59 : vector<16x128xf32> to vector<16x128xbf16>
    %c2 = arith.constant 2 : index
    %c0_29 = arith.constant 0 : index
    %c0_30 = arith.constant 0 : index
    %61 = vector.load %arg3[%c2, %c0_29, %c0_30] : memref<6x8x16xbf16, #tpu.memory_space<vmem>>, vector<1x8x16xbf16>
    %62 = vector.shape_cast %61 : vector<1x8x16xbf16> to vector<8x16xbf16>
    %cst_31 = arith.constant dense<0.000000e+00> : vector<8x128xf32>
    %63 = tpu.matmul %62, %60, %cst_31 {dimension_numbers = #tpu.dot_dimension_numbers<[1], [0], [0], [1], [0, 0, 1, 1], [], []>} : vector<8x16xbf16>, vector<16x128xbf16>, vector<8x128xf32> -> vector<8x128xf32>
    %64 = math.tanh %63 : vector<8x128xf32>
    %65 = arith.negf %63 : vector<8x128xf32>
    %66 = math.exp %65 : vector<8x128xf32>
    %cst_32 = arith.constant 1.000000e+00 : f32
    %67 = vector.broadcast %cst_32 : f32 to vector<8x128xf32>
    %68 = arith.addf %67, %66 : vector<8x128xf32>
    %69 = arith.divf %67, %68 : vector<8x128xf32>
    %70 = arith.mulf %64, %69 : vector<8x128xf32>
    %c2_33 = arith.constant 2 : index
    %c0_34 = arith.constant 0 : index
    %c0_35 = arith.constant 0 : index
    %71 = vector.load %arg4[%c2_33, %c0_34, %c0_35] : memref<6x12x8xbf16, #tpu.memory_space<vmem>>, vector<1x12x8xbf16>
    %72 = vector.shape_cast %71 : vector<1x12x8xbf16> to vector<12x8xbf16>
    %73 = arith.truncf %70 : vector<8x128xf32> to vector<8x128xbf16>
    %cst_36 = arith.constant dense<0.000000e+00> : vector<12x128xf32>
    %74 = tpu.matmul %72, %73, %cst_36 {dimension_numbers = #tpu.dot_dimension_numbers<[1], [0], [0], [1], [0, 0, 1, 1], [], []>} : vector<12x8xbf16>, vector<8x128xbf16>, vector<12x128xf32> -> vector<12x128xf32>
    %c2_37 = arith.constant 2 : index
    %c0_38 = arith.constant 0 : index
    %c0_39 = arith.constant 0 : index
    %75 = vector.load %arg5[%c2_37, %c0_38, %c0_39] : memref<6x12x1xf32, #tpu.memory_space<vmem>>, vector<1x12x1xf32>
    %76 = vector.shape_cast %75 : vector<1x12x1xf32> to vector<12x1xf32>
    %77 = vector.broadcast %76 : vector<12x1xf32> to vector<12x128xf32>
    %78 = arith.addf %74, %77 : vector<12x128xf32>
    %79 = vector.extract_strided_slice %78 {offsets = [0, 0], sizes = [8, 128], strides = [1, 1]} : vector<12x128xf32> to vector<8x128xf32>
    %80 = arith.addf %79, %55 : vector<8x128xf32>
    %81 = vector.extract_strided_slice %78 {offsets = [8, 0], sizes = [4, 128], strides = [1, 1]} : vector<12x128xf32> to vector<4x128xf32>
    %82 = arith.addf %57, %81 : vector<4x128xf32>
    %c1_i32_40 = arith.constant 1 : i32
    %83 = tpu.dynamic_rotate %80 by %c1_i32_40 dim 1 : vector<8x128xf32>, i32 -> vector<8x128xf32>
    %84 = tpu.concatenate %83, %80 in 0 : vector<8x128xf32>, vector<8x128xf32> -> vector<16x128xf32>
    %85 = arith.truncf %84 : vector<16x128xf32> to vector<16x128xbf16>
    %c3 = arith.constant 3 : index
    %c0_41 = arith.constant 0 : index
    %c0_42 = arith.constant 0 : index
    %86 = vector.load %arg3[%c3, %c0_41, %c0_42] : memref<6x8x16xbf16, #tpu.memory_space<vmem>>, vector<1x8x16xbf16>
    %87 = vector.shape_cast %86 : vector<1x8x16xbf16> to vector<8x16xbf16>
    %cst_43 = arith.constant dense<0.000000e+00> : vector<8x128xf32>
    %88 = tpu.matmul %87, %85, %cst_43 {dimension_numbers = #tpu.dot_dimension_numbers<[1], [0], [0], [1], [0, 0, 1, 1], [], []>} : vector<8x16xbf16>, vector<16x128xbf16>, vector<8x128xf32> -> vector<8x128xf32>
    %89 = math.tanh %88 : vector<8x128xf32>
    %90 = arith.negf %88 : vector<8x128xf32>
    %91 = math.exp %90 : vector<8x128xf32>
    %cst_44 = arith.constant 1.000000e+00 : f32
    %92 = vector.broadcast %cst_44 : f32 to vector<8x128xf32>
    %93 = arith.addf %92, %91 : vector<8x128xf32>
    %94 = arith.divf %92, %93 : vector<8x128xf32>
    %95 = arith.mulf %89, %94 : vector<8x128xf32>
    %c3_45 = arith.constant 3 : index
    %c0_46 = arith.constant 0 : index
    %c0_47 = arith.constant 0 : index
    %96 = vector.load %arg4[%c3_45, %c0_46, %c0_47] : memref<6x12x8xbf16, #tpu.memory_space<vmem>>, vector<1x12x8xbf16>
    %97 = vector.shape_cast %96 : vector<1x12x8xbf16> to vector<12x8xbf16>
    %98 = arith.truncf %95 : vector<8x128xf32> to vector<8x128xbf16>
    %cst_48 = arith.constant dense<0.000000e+00> : vector<12x128xf32>
    %99 = tpu.matmul %97, %98, %cst_48 {dimension_numbers = #tpu.dot_dimension_numbers<[1], [0], [0], [1], [0, 0, 1, 1], [], []>} : vector<12x8xbf16>, vector<8x128xbf16>, vector<12x128xf32> -> vector<12x128xf32>
    %c3_49 = arith.constant 3 : index
    %c0_50 = arith.constant 0 : index
    %c0_51 = arith.constant 0 : index
    %100 = vector.load %arg5[%c3_49, %c0_50, %c0_51] : memref<6x12x1xf32, #tpu.memory_space<vmem>>, vector<1x12x1xf32>
    %101 = vector.shape_cast %100 : vector<1x12x1xf32> to vector<12x1xf32>
    %102 = vector.broadcast %101 : vector<12x1xf32> to vector<12x128xf32>
    %103 = arith.addf %99, %102 : vector<12x128xf32>
    %104 = vector.extract_strided_slice %103 {offsets = [0, 0], sizes = [8, 128], strides = [1, 1]} : vector<12x128xf32> to vector<8x128xf32>
    %105 = arith.addf %104, %80 : vector<8x128xf32>
    %106 = vector.extract_strided_slice %103 {offsets = [8, 0], sizes = [4, 128], strides = [1, 1]} : vector<12x128xf32> to vector<4x128xf32>
    %107 = arith.addf %82, %106 : vector<4x128xf32>
    %c2_i32_52 = arith.constant 2 : i32
    %108 = tpu.dynamic_rotate %105 by %c2_i32_52 dim 1 : vector<8x128xf32>, i32 -> vector<8x128xf32>
    %109 = tpu.concatenate %108, %105 in 0 : vector<8x128xf32>, vector<8x128xf32> -> vector<16x128xf32>
    %110 = arith.truncf %109 : vector<16x128xf32> to vector<16x128xbf16>
    %c4 = arith.constant 4 : index
    %c0_53 = arith.constant 0 : index
    %c0_54 = arith.constant 0 : index
    %111 = vector.load %arg3[%c4, %c0_53, %c0_54] : memref<6x8x16xbf16, #tpu.memory_space<vmem>>, vector<1x8x16xbf16>
    %112 = vector.shape_cast %111 : vector<1x8x16xbf16> to vector<8x16xbf16>
    %cst_55 = arith.constant dense<0.000000e+00> : vector<8x128xf32>
    %113 = tpu.matmul %112, %110, %cst_55 {dimension_numbers = #tpu.dot_dimension_numbers<[1], [0], [0], [1], [0, 0, 1, 1], [], []>} : vector<8x16xbf16>, vector<16x128xbf16>, vector<8x128xf32> -> vector<8x128xf32>
    %114 = math.tanh %113 : vector<8x128xf32>
    %115 = arith.negf %113 : vector<8x128xf32>
    %116 = math.exp %115 : vector<8x128xf32>
    %cst_56 = arith.constant 1.000000e+00 : f32
    %117 = vector.broadcast %cst_56 : f32 to vector<8x128xf32>
    %118 = arith.addf %117, %116 : vector<8x128xf32>
    %119 = arith.divf %117, %118 : vector<8x128xf32>
    %120 = arith.mulf %114, %119 : vector<8x128xf32>
    %c4_57 = arith.constant 4 : index
    %c0_58 = arith.constant 0 : index
    %c0_59 = arith.constant 0 : index
    %121 = vector.load %arg4[%c4_57, %c0_58, %c0_59] : memref<6x12x8xbf16, #tpu.memory_space<vmem>>, vector<1x12x8xbf16>
    %122 = vector.shape_cast %121 : vector<1x12x8xbf16> to vector<12x8xbf16>
    %123 = arith.truncf %120 : vector<8x128xf32> to vector<8x128xbf16>
    %cst_60 = arith.constant dense<0.000000e+00> : vector<12x128xf32>
    %124 = tpu.matmul %122, %123, %cst_60 {dimension_numbers = #tpu.dot_dimension_numbers<[1], [0], [0], [1], [0, 0, 1, 1], [], []>} : vector<12x8xbf16>, vector<8x128xbf16>, vector<12x128xf32> -> vector<12x128xf32>
    %c4_61 = arith.constant 4 : index
    %c0_62 = arith.constant 0 : index
    %c0_63 = arith.constant 0 : index
    %125 = vector.load %arg5[%c4_61, %c0_62, %c0_63] : memref<6x12x1xf32, #tpu.memory_space<vmem>>, vector<1x12x1xf32>
    %126 = vector.shape_cast %125 : vector<1x12x1xf32> to vector<12x1xf32>
    %127 = vector.broadcast %126 : vector<12x1xf32> to vector<12x128xf32>
    %128 = arith.addf %124, %127 : vector<12x128xf32>
    %129 = vector.extract_strided_slice %128 {offsets = [0, 0], sizes = [8, 128], strides = [1, 1]} : vector<12x128xf32> to vector<8x128xf32>
    %130 = arith.addf %129, %105 : vector<8x128xf32>
    %131 = vector.extract_strided_slice %128 {offsets = [8, 0], sizes = [4, 128], strides = [1, 1]} : vector<12x128xf32> to vector<4x128xf32>
    %132 = arith.addf %107, %131 : vector<4x128xf32>
    %c4_i32_64 = arith.constant 4 : i32
    %133 = tpu.dynamic_rotate %130 by %c4_i32_64 dim 1 : vector<8x128xf32>, i32 -> vector<8x128xf32>
    %134 = tpu.concatenate %133, %130 in 0 : vector<8x128xf32>, vector<8x128xf32> -> vector<16x128xf32>
    %135 = arith.truncf %134 : vector<16x128xf32> to vector<16x128xbf16>
    %c5 = arith.constant 5 : index
    %c0_65 = arith.constant 0 : index
    %c0_66 = arith.constant 0 : index
    %136 = vector.load %arg3[%c5, %c0_65, %c0_66] : memref<6x8x16xbf16, #tpu.memory_space<vmem>>, vector<1x8x16xbf16>
    %137 = vector.shape_cast %136 : vector<1x8x16xbf16> to vector<8x16xbf16>
    %cst_67 = arith.constant dense<0.000000e+00> : vector<8x128xf32>
    %138 = tpu.matmul %137, %135, %cst_67 {dimension_numbers = #tpu.dot_dimension_numbers<[1], [0], [0], [1], [0, 0, 1, 1], [], []>} : vector<8x16xbf16>, vector<16x128xbf16>, vector<8x128xf32> -> vector<8x128xf32>
    %139 = math.tanh %138 : vector<8x128xf32>
    %140 = arith.negf %138 : vector<8x128xf32>
    %141 = math.exp %140 : vector<8x128xf32>
    %cst_68 = arith.constant 1.000000e+00 : f32
    %142 = vector.broadcast %cst_68 : f32 to vector<8x128xf32>
    %143 = arith.addf %142, %141 : vector<8x128xf32>
    %144 = arith.divf %142, %143 : vector<8x128xf32>
    %145 = arith.mulf %139, %144 : vector<8x128xf32>
    %c5_69 = arith.constant 5 : index
    %c0_70 = arith.constant 0 : index
    %c0_71 = arith.constant 0 : index
    %146 = vector.load %arg4[%c5_69, %c0_70, %c0_71] : memref<6x12x8xbf16, #tpu.memory_space<vmem>>, vector<1x12x8xbf16>
    %147 = vector.shape_cast %146 : vector<1x12x8xbf16> to vector<12x8xbf16>
    %148 = arith.truncf %145 : vector<8x128xf32> to vector<8x128xbf16>
    %cst_72 = arith.constant dense<0.000000e+00> : vector<12x128xf32>
    %149 = tpu.matmul %147, %148, %cst_72 {dimension_numbers = #tpu.dot_dimension_numbers<[1], [0], [0], [1], [0, 0, 1, 1], [], []>} : vector<12x8xbf16>, vector<8x128xbf16>, vector<12x128xf32> -> vector<12x128xf32>
    %c5_73 = arith.constant 5 : index
    %c0_74 = arith.constant 0 : index
    %c0_75 = arith.constant 0 : index
    %150 = vector.load %arg5[%c5_73, %c0_74, %c0_75] : memref<6x12x1xf32, #tpu.memory_space<vmem>>, vector<1x12x1xf32>
    %151 = vector.shape_cast %150 : vector<1x12x1xf32> to vector<12x1xf32>
    %152 = vector.broadcast %151 : vector<12x1xf32> to vector<12x128xf32>
    %153 = arith.addf %149, %152 : vector<12x128xf32>
    %154 = vector.extract_strided_slice %153 {offsets = [8, 0], sizes = [4, 128], strides = [1, 1]} : vector<12x128xf32> to vector<4x128xf32>
    %155 = arith.addf %132, %154 : vector<4x128xf32>
    %cst_76 = arith.constant 0.000000e+00 : f32
    %156 = vector.broadcast %cst_76 : f32 to vector<4x128xf32>
    %157 = arith.maximumf %155, %156 : vector<4x128xf32>
    %c0_77 = arith.constant 0 : index
    %c0_78 = arith.constant 0 : index
    %158 = vector.load %arg6[%c0_77, %c0_78] : memref<4x4xbf16, #tpu.memory_space<vmem>>, vector<4x4xbf16>
    %159 = arith.truncf %157 : vector<4x128xf32> to vector<4x128xbf16>
    %cst_79 = arith.constant dense<0.000000e+00> : vector<4x128xf32>
    %160 = tpu.matmul %158, %159, %cst_79 {dimension_numbers = #tpu.dot_dimension_numbers<[1], [0], [0], [1], [0, 0, 1, 1], [], []>} : vector<4x4xbf16>, vector<4x128xbf16>, vector<4x128xf32> -> vector<4x128xf32>
    %c0_80 = arith.constant 0 : index
    %c0_81 = arith.constant 0 : index
    %161 = vector.load %arg7[%c0_80, %c0_81] : memref<4x1xf32, #tpu.memory_space<vmem>>, vector<4x1xf32>
    %162 = vector.broadcast %161 : vector<4x1xf32> to vector<4x128xf32>
    %163 = arith.addf %160, %162 : vector<4x128xf32>
    %cst_82 = arith.constant 0.000000e+00 : f32
    %164 = vector.broadcast %cst_82 : f32 to vector<4x128xf32>
    %165 = arith.maximumf %163, %164 : vector<4x128xf32>
    %c0_83 = arith.constant 0 : index
    %c0_84 = arith.constant 0 : index
    %166 = vector.load %arg8[%c0_83, %c0_84] : memref<4x4xbf16, #tpu.memory_space<vmem>>, vector<4x4xbf16>
    %167 = arith.truncf %165 : vector<4x128xf32> to vector<4x128xbf16>
    %cst_85 = arith.constant dense<0.000000e+00> : vector<4x128xf32>
    %168 = tpu.matmul %166, %167, %cst_85 {dimension_numbers = #tpu.dot_dimension_numbers<[1], [0], [0], [1], [0, 0, 1, 1], [], []>} : vector<4x4xbf16>, vector<4x128xbf16>, vector<4x128xf32> -> vector<4x128xf32>
    %c0_86 = arith.constant 0 : index
    %c0_87 = arith.constant 0 : index
    %169 = vector.load %arg9[%c0_86, %c0_87] : memref<4x1xf32, #tpu.memory_space<vmem>>, vector<4x1xf32>
    %170 = vector.broadcast %169 : vector<4x1xf32> to vector<4x128xf32>
    %171 = arith.addf %168, %170 : vector<4x128xf32>
    %cst_88 = arith.constant dense<0xFF800000> : vector<128xf32>
    %172 = vector.multi_reduction <maximumf>, %171, %cst_88 [0] : vector<4x128xf32> to vector<128xf32>
    %173 = vector.shape_cast %172 : vector<128xf32> to vector<1x128xf32>
    %174 = vector.broadcast %173 : vector<1x128xf32> to vector<4x128xf32>
    %175 = arith.subf %171, %174 : vector<4x128xf32>
    %176 = math.exp %175 : vector<4x128xf32>
    %cst_89 = arith.constant dense<0.000000e+00> : vector<128xf32>
    %177 = vector.multi_reduction <add>, %176, %cst_89 [0] : vector<4x128xf32> to vector<128xf32>
    %178 = vector.shape_cast %177 : vector<128xf32> to vector<1x128xf32>
    %179 = tpu.reciprocal %178 : vector<1x128xf32> -> vector<1x128xf32>
    %180 = vector.broadcast %179 : vector<1x128xf32> to vector<4x128xf32>
    %181 = arith.mulf %176, %180 : vector<4x128xf32>
    %c0_90 = arith.constant 0 : index
    %c0_91 = arith.constant 0 : index
    %c0_92 = arith.constant 0 : index
    %182 = vector.load %arg10[%c0_90, %c0_91, %c0_92] : memref<1x4x128xf32, #tpu.memory_space<vmem>>, vector<1x4x128xf32>
    %183 = vector.shape_cast %182 : vector<1x4x128xf32> to vector<4x128xf32>
    %184 = vector.shape_cast %181 : vector<4x128xf32> to vector<1x4x128xf32>
    tpu.vector_store %arg10[%c0_90, %c0_91, %c0_92], %184 {strides = array<i32>} : memref<1x4x128xf32, #tpu.memory_space<vmem>>, vector<1x4x128xf32>,
    return
  }
  func.func @transform_0(%arg0: i32) -> (i32, i32, i32) {
    %c0_i32 = arith.constant 0 : i32
    %c0_i32_0 = arith.constant 0 : i32
    %c0_i32_1 = arith.constant 0 : i32
    return %arg0, %c0_i32, %c0_i32_0 : i32, i32, i32
  }
  func.func @transform_1(%arg0: i32) -> (i32, i32) {
    %c0_i32 = arith.constant 0 : i32
    %c0_i32_0 = arith.constant 0 : i32
    %c0_i32_1 = arith.constant 0 : i32
    return %c0_i32, %c0_i32_0 : i32, i32
  }
  func.func @transform_2(%arg0: i32) -> (i32, i32, i32) {
    %c0_i32 = arith.constant 0 : i32
    %c0_i32_0 = arith.constant 0 : i32
    %c0_i32_1 = arith.constant 0 : i32
    %c0_i32_2 = arith.constant 0 : i32
    return %c0_i32, %c0_i32_0, %c0_i32_1 : i32, i32, i32
  }
  func.func @transform_3(%arg0: i32) -> (i32, i32, i32) {
    %c0_i32 = arith.constant 0 : i32
    %c0_i32_0 = arith.constant 0 : i32
    %c0_i32_1 = arith.constant 0 : i32
    %c0_i32_2 = arith.constant 0 : i32
    return %c0_i32, %c0_i32_0, %c0_i32_1 : i32, i32, i32
  }
  func.func @transform_4(%arg0: i32) -> (i32, i32, i32) {
    %c0_i32 = arith.constant 0 : i32
    %c0_i32_0 = arith.constant 0 : i32
    %c0_i32_1 = arith.constant 0 : i32
    %c0_i32_2 = arith.constant 0 : i32
    return %c0_i32, %c0_i32_0, %c0_i32_1 : i32, i32, i32
  }
  func.func @transform_5(%arg0: i32) -> (i32, i32) {
    %c0_i32 = arith.constant 0 : i32
    %c0_i32_0 = arith.constant 0 : i32
    %c0_i32_1 = arith.constant 0 : i32
    return %c0_i32, %c0_i32_0 : i32, i32
  }
  func.func @transform_6(%arg0: i32) -> (i32, i32) {
    %c0_i32 = arith.constant 0 : i32
    %c0_i32_0 = arith.constant 0 : i32
    %c0_i32_1 = arith.constant 0 : i32
    return %c0_i32, %c0_i32_0 : i32, i32
  }
  func.func @transform_7(%arg0: i32) -> (i32, i32) {
    %c0_i32 = arith.constant 0 : i32
    %c0_i32_0 = arith.constant 0 : i32
    %c0_i32_1 = arith.constant 0 : i32
    return %c0_i32, %c0_i32_0 : i32, i32
  }
  func.func @transform_8(%arg0: i32) -> (i32, i32) {
    %c0_i32 = arith.constant 0 : i32
    %c0_i32_0 = arith.constant 0 : i32
    %c0_i32_1 = arith.constant 0 : i32
    return %c0_i32, %c0_i32_0 : i32, i32
  }
  func.func @transform_9(%arg0: i32) -> (i32, i32, i32) {
    %c0_i32 = arith.constant 0 : i32
    %c0_i32_0 = arith.constant 0 : i32
    %c0_i32_1 = arith.constant 0 : i32
    return %arg0, %c0_i32, %c0_i32_0 : i32, i32, i32
  }
}

</mosaic_0001>

<bundles_post_ra>
// kernel: tpu_custom_call.1
= control target key start
LH: loop header
LB: loop body
LE: loop exit
PB: predicated region body
PF: predicated region fallthrough
CT: control target
= control target key end

     0   :  { %14 = vsyncpa [#allocation3], 0  ;;  %s2015_s0 = inlined_call_operand.vmem [shape: f32[2,4,128], index: 0, kind: input, shape index: {}]   ;;  %s2016_s1 = inlined_call_operand.vmem [shape: bf16[8,8], index: 1, kind: input, shape index: {}]   ;;  %s2017_s2 = inlined_call_operand.vmem [shape: bf16[6,8,16], index: 2, kind: input, shape index: {}]   ;;  %s2018_s3 = inlined_call_operand.vmem [shape: bf16[6,12,8], index: 3, kind: input, shape index: {}]   ;;  %s2019_s4 = inlined_call_operand.vmem [shape: f32[6,12,1], index: 4, kind: input, shape index: {}]   ;;  %s2020_s5 = inlined_call_operand.vmem [shape: bf16[4,4], index: 5, kind: input, shape index: {}]   ;;  %s2021_s6 = inlined_call_operand.vmem [shape: f32[4,1], index: 6, kind: input, shape index: {}]   ;;  %s2022_s7 = inlined_call_operand.vmem [shape: bf16[4,4], index: 7, kind: input, shape index: {}]   ;;  %s2023_s8 = inlined_call_operand.vmem [shape: f32[4,1], index: 8, kind: input, shape index: {}]   ;;  %s2024_s9 = inlined_call_operand.hbm [shape: f32[2,4,128], index: 9, kind: output, shape index: {}]  }
   0x1   :  { %16 = vsyncpa [#allocation3 + $0x1], 0  ;;  %s1744_s30 = smov 0   ;;  %s1746_s10 = smov 0  }
   0x2   :  { %s1748_s11 = smov 0   ;;  %s1750_s12 = smov 0  }
   0x3 LB: > { %s1765_s13 = sadd.s32 4294967295, %s1685_s12   ;;  %s1348_s14 = sadd.s32 4294967294, %s1685_s12   ;;  %s1685_s12 = sphi %s1750_s12, %s2032_s12   ;;  %s1681_s11 = sphi %s1748_s11, %s2031_s11   ;;  %s1677_s10 = sphi %s1746_s10, %s2030_s10   ;;  %s1673_s30 = sphi %s1744_s30, %s2029_s30  }
   0x4   : > { %s1769_s15 = sadd.s32 1, %s1685_s12   ;;  %s223_s16 = sadd.s32 1, %s1681_s11 }
   0x5   : > { %s220_s17 = ssub.s32 %s1685_s12, %s1769_s15  ;;  %p233_p0 = scmp.ne.s32.totalorder %s1681_s11, %s1677_s10 }
   0x6   : > { %p221_p1 = scmp.eq.s32.totalorder %s220_s17, 0  ;;  %p234_p2 = scmp.eq.s32.totalorder %s1765_s13, 1 }
   0x7   : > { %p239_p3 = scmp.ne.s32.totalorder %s1677_s10, %s1673_s30  ;;  %p240_p4 = scmp.eq.s32.totalorder %s1348_s14, 1 }
   0x8   : > { %s1780_s18 = scalar_select %p221_p1, %s1681_s11, %s223_s16  }
   0x9   : > { %p1782_p5 = por %p234_p2, %p233_p0  ;;  %p1786_p6 = por %p240_p4, %p239_p3 }
   0xa   : > { %p1351_p7 = scmp.ge.s32.totalorder %s1685_s12, 1  ;;  %p289_p8 = scmp.lt.s32.totalorder %s1685_s12, 3 }
   0xc   : > { %p290_p9 = pnand %p1351_p7, %p289_p8 }
   0xd   : > { %p324_p10 = scmp.lt.s32.totalorder (!%p290_p9), %s1765_s13, 1  ;;  %v1687_v0 = vmov (!%p290_p9), 0.0   ;;  %vm1688_vm0 = vmmov (!%p290_p9), 0   ;;  %s1689_s26 = smov (!%p290_p9), 1   ;;  %vm335_vm1 = vcmask (!%p290_p9), 1043456   ;;  %vm339_vm2 = vcmask (!%p290_p9), 64512  }
   0xe   : > { %293 = sbr.rel (%p290_p9) target bundleno = 4366 (0x110e), region = 56  ;;  %1440 = vmatprep.subr.bf16.mxu0 (!%p290_p9), %v1687_v0  ;;  %1442 = vmatprep.mubr.msk.bf16.mxu0 (!%p290_p9), %vm1688_vm0, %v1687_v0  ;;  %v338_v7 = vld [vmem:[%s2016_s1] sm:$0xf] (!%p290_p9)  ;;  %vm390_vm3 = vcmask (!%p290_p9), 130048   ;;  %v1690_v16 = vmov (!%p290_p9), 0   ;;  %s1691_s23 = smov (!%p290_p9), 2  }
   0xf   : > { %1446 = vmatprep.subr.bf16.mxu1 (!%p290_p9), %v1687_v0  ;;  %1448 = vmatprep.mubr.msk.bf16.mxu1 (!%p290_p9), %vm1688_vm0, %v1687_v0  ;;  %v389_v14 = vld [vmem:[%s2017_s2] sm:$0xf] (!%p290_p9)  ;;  %v1359_v39 = vld [vmem:[%s2017_s2 + $0x4] sm:$0xf] (!%p290_p9)  ;;  %v1364_v40 = vld [vmem:[%s2019_s4 + $0x10] sm:$0xff] (!%p290_p9)  ;;  %s2025_s16 = smov (!%p290_p9), 4  }
  0x10   : > { %v445_v15 = vld [vmem:[%s2019_s4] sm:$0xff] (!%p290_p9)  ;;  %1575 = vset.pattern.permute.xlu1 (!%p290_p9), %v1690_v16  ;;  %1576 = vset.pattern.permute.xlu0 (!%p290_p9), %v1690_v16  ;;  %v1578_v53 = vld [vmem:[%s2018_s3 + $0x8] sm:$0x3f] (!%p290_p9)   ;;  %v1382_v62 = vld [vmem:[%s2019_s4 + $0x30] sm:$0xff] (!%p290_p9)  ;;  %vm1156_vm4 = vcmask (!%p290_p9), 1041408   ;;  %vm1152_vm5 = vcmask (!%p290_p9), 31744  }
  0x11   : > { %449 = vperm.xlu1 (!%p290_p9), %1575, %v445_v15   ;;  %v1577_v29 = vld [vmem:[%s2018_s3] sm:$0x3f] (!%p290_p9)   ;;  %s321_s14 = sand.u32 (!%p290_p9), 1, %s1677_s10   ;;  %s1407_s17 = sshll.u32 (!%p290_p9), %s1765_s13, 6 }
  0x12   : > { %v1373_v61 = vld [vmem:[%s2019_s4 + $0x20] sm:$0xff] (!%p290_p9)  ;;  %s1276_s27 = scalar_lea.sflag (!%p290_p9), [#allocation3], %s321_s14 }
  0x13   : > { %v1391_v63 = vld [vmem:[%s2019_s4 + $0x40] sm:$0xff] (!%p290_p9) }
  0x15   : > { %s325_s21 = scalar_select %p324_p10, %s1765_s13, 1 }
  0x16   : > { %s1693_s13 = smov [#allocation2]  }
  0x17   : > { %s1353_s22 = sshll.u32 %s325_s21, 2  ;;  %s1627_s28 = sshll.u32 %s1693_s13, 4  ;;  %s1628_s28 = int_to_ptr.vmem [resolvable:$false] %s1627_s28 }
  0x18   : > { %s327_s25 = scalar_lea.vmem %s2015_s0, %s1353_s22  ;;  %s1629_s29 = scalar_lea.vmem %s1628_s28, 128 }
  0x19   : > { %v329_v1 = vld [vmem:[%s327_s25] sm:$0xf]  ;;  %s2028_s25 = smov 4  }
  0x1a   : > { %330 = vrot.lane.b32.xlu0 %v329_v1, %s1689_s26  ;;  %v333_v2 = vrot.slane %v329_v1, 4  ;;  %v446_v1 = vld [vmem:[%s2019_s4 + $0x8] sm:$0xf] }
  0x8c   : > { %v331_v3 = vpop.permute.xlu0 %330 }
  0x8d   : > { %v336_v4 = vsel %vm335_vm1, %v331_v3, %v333_v2  ;;  %v1374_v2 = vld [vmem:[%s2019_s4 + $0x28] sm:$0xf] }
  0x8e   : > { %v337_v5 = vpack.c.bf16 %v336_v4, %v336_v4  ;;  %v1392_v3 = vld [vmem:[%s2019_s4 + $0x48] sm:$0xf]  ;;  %v1146_v4 = vld [vmem:[%s2021_s6] sm:$0xf] }
  0x90   : > { %v344_v6 = vsel %vm335_vm1, %v337_v5, 0  ;;  %v450_v30 = vpop.permute.xlu1 %449 }
  0x91   : > { %1441 = vmatpush3.bf16.msra.mxu0 %v344_v6 }
  0x92   : > { %1452 = vmatprep.subr.bf16.mxu0 %v1687_v0 }
  0x94   : > { %1443 = vmatmul.mubr.msk.bf16.vlgmr.msra.gmra.mrb[0].mxu0 %vm339_vm2, %v338_v7  ;;  %v1368_v7 = vld [vmem:[%s2017_s2 + $0x8] sm:$0xf] }
  0x95   : > { %1454 = vmatprep.mubr.msk.bf16.mxu0 %vm1688_vm0, %v1687_v0 }
 0x167   : > { %v380_v8 = vpop.f32.mrb[0].mxu0 }
 0x168   : > { %386 = vrot.lane.b32.xlu0 %v380_v8, %s1689_s26  ;;  %v1444_v9 = vpop.f32.mrb[1].mxu0 }
 0x169   : > { %v383_v10 = vpop.f32.mrb[2].mxu0 }
 0x16a   : > { %v1445_v11 = vpop.f32.mrb[3].mxu0 }
 0x16c   : > { %576 = vperm.xlu0 %1576, %v1364_v40  }
 0x1da   : > { %v387_v12 = vpop.permute.xlu0 %386 }
 0x1db   : > { %v388_v13 = vpack.c.bf16 %v380_v8, %v387_v12 }
 0x1dd   : > { %1447 = vmatpush3.bf16.msra.mxu1 %v388_v13 }
 0x1de   : > { %1458 = vmatprep.subr.bf16.mxu1 %v1687_v0 }
 0x1e0   : > { %1449 = vmatmul.mubr.msk.bf16.vlgmr.msra.gmra.mrb[0].mxu1 %vm390_vm3, %v389_v14 }
 0x1e1   : > { %1460 = vmatprep.mubr.msk.bf16.mxu1 %vm1688_vm0, %v1687_v0 }
 0x1eb   : > { %v577_v54 = vpop.permute.xlu0 %576 }
 0x2b3   : > { %v428_v17 = vpop.f32.mrb[0].mxu1 }
 0x2b4   : > { %v1356_v18 = vmul.f32 -1.442695, %v428_v17  ;;  %v1450_v19 = vpop.f32.mrb[1].mxu1 }
 0x2b5   : > { %v431_v20 = vpop.f32.mrb[2].mxu1 }
 0x2b6   : > { %1583 = vpow2.f32 %v1356_v18  ;;  %v1451_v21 = vpop.f32.mrb[3].mxu1  ;;  %v1579_v20 = vld [vmem:[%s2018_s3 + $0x10] sm:$0x3f]  }
 0x2b7   : > { %1585 = vtanh.f32 %v428_v17 }
 0x2c0   : > { %v1584_v22 = vpop.eup %1583 }
 0x2c1   : > { %v438_v23 = vadd.f32 1.0, %v1584_v22  ;;  %v1586_v24 = vpop.eup %1585 }
 0x2c3   : > { %1587 = vrcp.f32 %v438_v23 }
 0x2cd   : > { %v1588_v25 = vpop.eup %1587 }
 0x2ce   : > { %v441_v26 = vmul.f32 %v1588_v25, %v1586_v24 }
 0x2d0   : > { %v444_v27 = vpack.c.bf16 %v441_v26, %v441_v26 }
 0x2d2   : > { %v466_v28 = vsel %vm335_vm1, %v444_v27, 0 }
 0x2d3   : > { %1453 = vmatpush3.bf16.msra.mxu0 %v466_v28 }
 0x2d4   : > { %1464 = vmatprep.subr.bf16.mxu0 %v1687_v0 }
 0x2d6   : > { %1455 = vmatmul.mubr.msk.bf16.vlgmr.msra.gmra.mrb[4].mxu0 %vm339_vm2, %v1577_v29 }
 0x2d7   : > { %1466 = vmatprep.mubr.msk.bf16.mxu0 %vm1688_vm0, %v1687_v0 }
 0x3a9   : > { %v502_v31 = vpop.f32.mrb[4].mxu0 }
 0x3aa   : > { %v503_v32 = vadd.f32 %v502_v31, %v450_v30  ;;  %v1456_v33 = vpop.f32.mrb[5].mxu0  ;;  %v1377_v30 = vld [vmem:[%s2017_s2 + $0xc] sm:$0xf] }
 0x3ab   : > { %v1832_v34 = vpop.f32.mrb[6].mxu0 }
 0x3ac   : > { %v509_v35 = vadd.f32 %v503_v32, %v380_v8  ;;  %v1457_v36 = vpop.f32.mrb[7].mxu0 }
 0x3ae   : > { %511 = vrot.lane.b32.xlu1 %v509_v35, %s1691_s23 }
 0x420   : > { %v512_v37 = vpop.permute.xlu1 %511 }
 0x421   : > { %v513_v38 = vpack.c.bf16 %v509_v35, %v512_v37 }
 0x423   : > { %1459 = vmatpush3.bf16.msra.mxu1 %v513_v38 }
 0x424   : > { %1470 = vmatprep.subr.bf16.mxu1 %v1687_v0 }
 0x426   : > { %1461 = vmatmul.mubr.msk.bf16.vlgmr.msra.gmra.mrb[4].mxu1 %vm390_vm3, %v1359_v39 }
 0x427   : > { %1472 = vmatprep.mubr.msk.bf16.mxu1 %vm1688_vm0, %v1687_v0 }
 0x4f9   : > { %v553_v41 = vpop.f32.mrb[4].mxu1 }
 0x4fa   : > { %v1361_v42 = vmul.f32 -1.442695, %v553_v41  ;;  %v1462_v43 = vpop.f32.mrb[5].mxu1 }
 0x4fb   : > { %v556_v44 = vpop.f32.mrb[6].mxu1 }
 0x4fc   : > { %1589 = vpow2.f32 %v1361_v42  ;;  %v1463_v45 = vpop.f32.mrb[7].mxu1  ;;  %v1580_v44 = vld [vmem:[%s2018_s3 + $0x18] sm:$0x3f]  }
 0x4fd   : > { %1591 = vtanh.f32 %v553_v41 }
 0x506   : > { %v1590_v46 = vpop.eup %1589 }
 0x507   : > { %v563_v47 = vadd.f32 1.0, %v1590_v46  ;;  %v1592_v48 = vpop.eup %1591 }
 0x509   : > { %1593 = vrcp.f32 %v563_v47 }
 0x513   : > { %v1594_v49 = vpop.eup %1593 }
 0x514   : > { %v566_v50 = vmul.f32 %v1594_v49, %v1592_v48 }
 0x516   : > { %v570_v51 = vpack.c.bf16 %v566_v50, %v566_v50 }
 0x518   : > { %v593_v52 = vsel %vm335_vm1, %v570_v51, 0 }
 0x519   : > { %1465 = vmatpush3.bf16.msra.mxu0 %v593_v52 }
 0x51a   : > { %1476 = vmatprep.subr.bf16.mxu0 %v1687_v0 }
 0x51c   : > { %1467 = vmatmul.mubr.msk.bf16.vlgmr.msra.gmra.mrb[8].mxu0 %vm339_vm2, %v1578_v53 }
 0x51d   : > { %1478 = vmatprep.mubr.msk.bf16.mxu0 %vm1688_vm0, %v1687_v0 }
 0x5ef   : > { %v629_v55 = vpop.f32.mrb[8].mxu0 }
 0x5f0   : > { %v630_v56 = vadd.f32 %v629_v55, %v577_v54  ;;  %v1468_v57 = vpop.f32.mrb[9].mxu0  ;;  %v1386_v54 = vld [vmem:[%s2017_s2 + $0x10] sm:$0xf] }
 0x5f1   : > { %v1853_v58 = vpop.f32.mrb[10].mxu0 }
 0x5f2   : > { %v636_v59 = vadd.f32 %v630_v56, %v509_v35  ;;  %v1469_v60 = vpop.f32.mrb[11].mxu0 }
 0x5f4   : > { %638 = vrot.lane.b32.xlu1 %v636_v59, %s2025_s16 }
 0x5f8   : > { %703 = vperm.xlu1 %1575, %v1373_v61  }
 0x5fc   : > { %830 = vperm.xlu1 %1575, %v1382_v62  }
 0x600   : > { %957 = vperm.xlu1 %1575, %v1391_v63  }
 0x604   : > { %454 = vperm.xlu1 %1575, %v446_v1  }
 0x608   : > { %708 = vperm.xlu1 %1575, %v1374_v2  }
 0x60c   : > { %962 = vperm.xlu1 %1575, %v1392_v3  }
 0x610   : > { %1149 = vperm.xlu1 %1575, %v1146_v4  }
 0x666   : > { %v639_v5 = vpop.permute.xlu1 %638 }
 0x667   : > { %v640_v6 = vpack.c.bf16 %v636_v59, %v639_v5  ;;  %v1581_v5 = vld [vmem:[%s2018_s3 + $0x20] sm:$0x3f]  }
 0x669   : > { %1471 = vmatpush3.bf16.msra.mxu1 %v640_v6 }
 0x66a   : > { %1482 = vmatprep.subr.bf16.mxu1 %v1687_v0 }
 0x66c   : > { %1473 = vmatmul.mubr.msk.bf16.vlgmr.msra.gmra.mrb[8].mxu1 %vm390_vm3, %v1368_v7 }
 0x66d   : > { %1484 = vmatprep.mubr.msk.bf16.mxu1 %vm1688_vm0, %v1687_v0 }
 0x677   : > { %v704_v21 = vpop.permute.xlu1 %703 }
 0x67b   : > { %v831_v45 = vpop.permute.xlu1 %830 }
 0x67f   : > { %v958_v6 = vpop.permute.xlu1 %957 }
 0x73f   : > { %v680_v8 = vpop.f32.mrb[8].mxu1 }
 0x740   : > { %v1370_v9 = vmul.f32 -1.442695, %v680_v8  ;;  %v1474_v10 = vpop.f32.mrb[9].mxu1 }
 0x741   : > { %v683_v11 = vpop.f32.mrb[10].mxu1 }
 0x742   : > { %1595 = vpow2.f32 %v1370_v9  ;;  %v1475_v12 = vpop.f32.mrb[11].mxu1 }
 0x743   : > { %1597 = vtanh.f32 %v680_v8 }
 0x74c   : > { %v1596_v13 = vpop.eup %1595 }
 0x74d   : > { %v690_v14 = vadd.f32 1.0, %v1596_v13  ;;  %v1598_v15 = vpop.eup %1597  ;;  %v1365_v13 = vld [vmem:[%s2019_s4 + $0x18] sm:$0xf] }
 0x74f   : > { %1599 = vrcp.f32 %v690_v14  ;;  %v1383_v14 = vld [vmem:[%s2019_s4 + $0x38] sm:$0xf] }
 0x759   : > { %v1600_v16 = vpop.eup %1599 }
 0x75a   : > { %v693_v17 = vmul.f32 %v1600_v16, %v1598_v15  ;;  %v1401_v15 = vld [vmem:[%s2019_s4 + $0x58] sm:$0xf]  ;;  %v1203_v16 = vld [vmem:[%s2023_s8] sm:$0xf] }
 0x75c   : > { %v697_v18 = vpack.c.bf16 %v693_v17, %v693_v17 }
 0x75e   : > { %v720_v19 = vsel %vm335_vm1, %v697_v18, 0 }
 0x75f   : > { %1477 = vmatpush3.bf16.msra.mxu0 %v720_v19  ;;  %v1395_v19 = vld [vmem:[%s2017_s2 + $0x14] sm:$0xf] }
 0x760   : > { %1488 = vmatprep.subr.bf16.mxu0 %v1687_v0 }
 0x762   : > { %1479 = vmatmul.mubr.msk.bf16.vlgmr.msra.gmra.mrb[12].mxu0 %vm339_vm2, %v1579_v20  ;;  %v455_v20 = vpop.permute.xlu1 %454 }
 0x763   : > { %1490 = vmatprep.mubr.msk.bf16.mxu0 %vm1688_vm0, %v1687_v0 }
 0x835   : > { %v756_v22 = vpop.f32.mrb[12].mxu0 }
 0x836   : > { %v757_v23 = vadd.f32 %v756_v22, %v704_v21  ;;  %v1480_v24 = vpop.f32.mrb[13].mxu0  ;;  %v709_v21 = vpop.permute.xlu1 %708 }
 0x837   : > { %v1892_v25 = vpop.f32.mrb[14].mxu0 }
 0x838   : > { %v763_v26 = vadd.f32 %v757_v23, %v636_v59  ;;  %v1481_v27 = vpop.f32.mrb[15].mxu0  ;;  %v506_v23 = vadd.f32 %v1832_v34, %v455_v20 }
 0x83a   : > { %765 = vrot.lane.b32.xlu0 %v763_v26, %s1689_s26  ;;  %s1352_s26 = sshll.u32 %s321_s14, 2 }
 0x83b   : > { %s323_s21 = scalar_lea.vmem [#allocation2], %s1352_s26 }
 0x83c   : > { %s1289_s22 = sshll.u32 %s323_s21, 4  ;;  %s1975_s22 = int_to_ptr.vmem [resolvable:$true] %s1289_s22 }
 0x83d   : > { %s1623_s16 = scalar_lea.vmem %s1975_s22, 64  ;;  %p1630_p0 = scmp.lt.s32.totalorder %s1975_s22, %s1628_s28 }
 0x83e   : > { %p1624_p11 = scmp.ne.s32.totalorder %s1975_s22, %s1623_s16  ;;  %p1631_p1 = scmp.lt.s32.totalorder %s1629_s29, %s1623_s16 }
 0x840   : > { %p1625_p12 = pnand %p1624_p11, %p1782_p5  ;;  %p1632_p2 = por %p1631_p1, %p1630_p0 }
 0x842   : > { %p1626_p13 = pneg %p1625_p12 }
 0x844   : > { %p1633_p3 = pnand %p1632_p2, %p1626_p13 }
 0x8ac   : > { %v766_v28 = vpop.permute.xlu0 %765 }
 0x8ad   : > { %v767_v29 = vpack.c.bf16 %v763_v26, %v766_v28 }
 0x8af   : > { %1483 = vmatpush3.bf16.msra.mxu1 %v767_v29 }
 0x8b0   : > { %1494 = vmatprep.subr.bf16.mxu1 %v1687_v0 }
 0x8b2   : > { %1485 = vmatmul.mubr.msk.bf16.vlgmr.msra.gmra.mrb[12].mxu1 %vm390_vm3, %v1377_v30 }
 0x8b3   : > { %1496 = vmatprep.mubr.msk.bf16.mxu1 %vm1688_vm0, %v1687_v0 }
 0x985   : > { %v807_v31 = vpop.f32.mrb[12].mxu1 }
 0x986   : > { %v1379_v32 = vmul.f32 -1.442695, %v807_v31  ;;  %v1486_v33 = vpop.f32.mrb[13].mxu1 }
 0x987   : > { %v810_v35 = vpop.f32.mrb[14].mxu1 }
 0x988   : > { %1601 = vpow2.f32 %v1379_v32  ;;  %v1487_v36 = vpop.f32.mrb[15].mxu1 }
 0x989   : > { %1603 = vtanh.f32 %v807_v31  ;;  %v963_v31 = vpop.permute.xlu1 %962 }
 0x992   : > { %v1602_v37 = vpop.eup %1601 }
 0x993   : > { %v817_v38 = vadd.f32 1.0, %v1602_v37  ;;  %v1604_v39 = vpop.eup %1603 }
 0x995   : > { %1605 = vrcp.f32 %v817_v38 }
 0x99f   : > { %v1606_v40 = vpop.eup %1605 }
 0x9a0   : > { %v820_v41 = vmul.f32 %v1606_v40, %v1604_v39 }
 0x9a2   : > { %v824_v42 = vpack.c.bf16 %v820_v41, %v820_v41 }
 0x9a4   : > { %v847_v43 = vsel %vm335_vm1, %v824_v42, 0 }
 0x9a5   : > { %1489 = vmatpush3.bf16.msra.mxu0 %v847_v43 }
 0x9a6   : > { %1500 = vmatprep.subr.bf16.mxu0 %v1687_v0 }
 0x9a8   : > { %1491 = vmatmul.mubr.msk.bf16.vlgmr.msra.gmra.mrb[16].mxu0 %vm339_vm2, %v1580_v44 }
 0x9a9   : > { %1502 = vmatprep.mubr.msk.bf16.mxu0 %vm1688_vm0, %v1687_v0 }
 0xa7b   : > { %v883_v46 = vpop.f32.mrb[16].mxu0 }
 0xa7c   : > { %v884_v47 = vadd.f32 %v883_v46, %v831_v45  ;;  %v1492_v48 = vpop.f32.mrb[17].mxu0  ;;  %v1582_v45 = vld [vmem:[%s2018_s3 + $0x28] sm:$0x3f]  }
 0xa7d   : > { %v1910_v49 = vpop.f32.mrb[18].mxu0 }
 0xa7e   : > { %v890_v50 = vadd.f32 %v884_v47, %v763_v26  ;;  %v1493_v51 = vpop.f32.mrb[19].mxu0  ;;  %v760_v26 = vadd.f32 %v1892_v25, %v709_v21 }
 0xa80   : > { %892 = vrot.lane.b32.xlu0 %v890_v50, %s1691_s23 }
 0xaf2   : > { %v893_v52 = vpop.permute.xlu0 %892 }
 0xaf3   : > { %v894_v53 = vpack.c.bf16 %v890_v50, %v893_v52 }
 0xaf5   : > { %1495 = vmatpush3.bf16.msra.mxu1 %v894_v53 }
 0xaf6   : > { %1506 = vmatprep.subr.bf16.mxu1 %v1687_v0 }
 0xaf8   : > { %1497 = vmatmul.mubr.msk.bf16.vlgmr.msra.gmra.mrb[16].mxu1 %vm390_vm3, %v1386_v54 }
 0xaf9   : > { %1508 = vmatprep.mubr.msk.bf16.mxu1 %vm1688_vm0, %v1687_v0 }
 0xbcb   : > { %v934_v55 = vpop.f32.mrb[16].mxu1 }
 0xbcc   : > { %v1388_v56 = vmul.f32 -1.442695, %v934_v55  ;;  %v1498_v57 = vpop.f32.mrb[17].mxu1 }
 0xbcd   : > { %v937_v59 = vpop.f32.mrb[18].mxu1  ;;  %v1150_v57 = vpop.permute.xlu1 %1149 }
 0xbce   : > { %1607 = vpow2.f32 %v1388_v56  ;;  %v1499_v60 = vpop.f32.mrb[19].mxu1  ;;  %v1144_v56 = vld [vmem:[%s2020_s5] sm:$0x3] }
 0xbcf   : > { %1609 = vtanh.f32 %v934_v55 }
 0xbd8   : > { %v1608_v61 = vpop.eup %1607 }
 0xbd9   : > { %v944_v62 = vadd.f32 1.0, %v1608_v61  ;;  %v1610_v63 = vpop.eup %1609 }
 0xbdb   : > { %1611 = vrcp.f32 %v944_v62 }
 0xbe5   : > { %v1612_v1 = vpop.eup %1611 }
 0xbe6   : > { %v947_v2 = vmul.f32 %v1612_v1, %v1610_v63 }
 0xbe8   : > { %v951_v3 = vpack.c.bf16 %v947_v2, %v947_v2 }
 0xbea   : > { %v974_v4 = vsel %vm335_vm1, %v951_v3, 0  ;;  %v1201_v3 = vld [vmem:[%s2022_s7] sm:$0x3] }
 0xbeb   : > { %1501 = vmatpush3.bf16.msra.mxu0 %v974_v4 }
 0xbec   : > { %1512 = vmatprep.subr.bf16.mxu0 %v1687_v0 }
 0xbee   : > { %1503 = vmatmul.mubr.msk.bf16.vlgmr.msra.gmra.mrb[20].mxu0 %vm339_vm2, %v1581_v5 }
 0xbef   : > { %1514 = vmatprep.mubr.msk.bf16.mxu0 %vm1688_vm0, %v1687_v0 }
 0xcc1   : > { %v1010_v7 = vpop.f32.mrb[20].mxu0 }
 0xcc2   : > { %v1011_v8 = vadd.f32 %v1010_v7, %v958_v6  ;;  %v1504_v9 = vpop.f32.mrb[21].mxu0 }
 0xcc3   : > { %v1013_v10 = vpop.f32.mrb[22].mxu0 }
 0xcc4   : > { %v1017_v11 = vadd.f32 %v1011_v8, %v890_v50  ;;  %v1505_v12 = vpop.f32.mrb[23].mxu0  ;;  %v1014_v32 = vadd.f32 %v1013_v10, %v963_v31 }
 0xcc6   : > { %1019 = vrot.lane.b32.xlu0 %v1017_v11, %s2028_s25  ;;  %s1973_s25 = scalar_lea.hbm %s2024_s9, %s1407_s17 }
 0xcca   : > { %581 = vperm.xlu0 %1576, %v1365_v13  }
 0xcce   : > { %835 = vperm.xlu0 %1576, %v1383_v14  }
 0xcd2   : > { %1088 = vperm.xlu0 %1576, %v1401_v15  }
 0xcd6   : > { %1206 = vperm.xlu0 %1576, %v1203_v16  }
 0xd38   : > { %v1020_v17 = vpop.permute.xlu0 %1019 }
 0xd39   : > { %v1021_v18 = vpack.c.bf16 %v1017_v11, %v1020_v17 }
 0xd3b   : > { %1507 = vmatpush3.bf16.msra.mxu1 %v1021_v18 }
 0xd3c   : > { %1518 = vmatprep.subr.bf16.mxu1 %v1687_v0 }
 0xd3e   : > { %1509 = vmatmul.mubr.msk.bf16.vlgmr.msra.gmra.mrb[20].mxu1 %vm390_vm3, %v1395_v19 }
 0xd3f   : > { %1520 = vmatprep.mubr.msk.bf16.mxu1 %vm1688_vm0, %v1687_v0 }
 0xd49   : > { %v582_v22 = vpop.permute.xlu0 %581 }
 0xd4a   : > { %v633_v24 = vadd.f32 %v1853_v58, %v582_v22 }
 0xd4c   : > { %v637_v27 = vadd.f32 %v633_v24, %v506_v23 }
 0xd4d   : > { %v836_v28 = vpop.permute.xlu0 %835 }
 0xd4e   : > { %v764_v29 = vadd.f32 %v760_v26, %v637_v27  ;;  %v887_v30 = vadd.f32 %v1910_v49, %v836_v28 }
 0xd50   : > { %v891_v33 = vadd.f32 %v887_v30, %v764_v29 }
 0xd51   : > { %v1089_v48 = vpop.permute.xlu0 %1088 }
 0xd52   : > { %v1018_v35 = vadd.f32 %v1014_v32, %v891_v33 }
 0xd55   : > { %v1207_v4 = vpop.permute.xlu0 %1206 }
 0xe11   : > { %v1061_v36 = vpop.f32.mrb[20].mxu1 }
 0xe12   : > { %v1397_v37 = vmul.f32 -1.442695, %v1061_v36  ;;  %v1510_v38 = vpop.f32.mrb[21].mxu1 }
 0xe13   : > { %v1064_v39 = vpop.f32.mrb[22].mxu1 }
 0xe14   : > { %1613 = vpow2.f32 %v1397_v37  ;;  %v1511_v40 = vpop.f32.mrb[23].mxu1 }
 0xe15   : > { %1615 = vtanh.f32 %v1061_v36 }
 0xe1e   : > { %v1614_v34 = vpop.eup %1613 }
 0xe1f   : > { %v1071_v41 = vadd.f32 1.0, %v1614_v34  ;;  %v1616_v58 = vpop.eup %1615 }
 0xe21   : > { %1617 = vrcp.f32 %v1071_v41 }
 0xe2b   : > { %v1618_v25 = vpop.eup %1617 }
 0xe2c   : > { %v1074_v42 = vmul.f32 %v1618_v25, %v1616_v58 }
 0xe2e   : > { %v1078_v43 = vpack.c.bf16 %v1074_v42, %v1074_v42 }
 0xe30   : > { %v1100_v44 = vsel %vm335_vm1, %v1078_v43, 0 }
 0xe31   : > { %1513 = vmatpush3.bf16.msra.mxu0 %v1100_v44 }
 0xe32   : > { %1524 = vmatprep.subr.bf16.mxu0 %v1687_v0 }
 0xe34   : > { %1515 = vmatmul.mubr.msk.bf16.vlgmr.msra.gmra.mrb[24].mxu0 %vm339_vm2, %v1582_v45 }
 0xe35   : > { %1526 = vmatprep.mubr.msk.bf16.mxu0 %vm1688_vm0, %v1687_v0 }
 0xf07   : > { %v1136_v46 = vpop.f32.mrb[24].mxu0 }
 0xf08   : > { %v1516_v47 = vpop.f32.mrb[25].mxu0 }
 0xf09   : > { %v1138_v49 = vpop.f32.mrb[26].mxu0 }
 0xf0a   : > { %v1139_v50 = vadd.f32 %v1138_v49, %v1089_v48  ;;  %v1517_v51 = vpop.f32.mrb[27].mxu0 }
 0xf0c   : > { %v1142_v52 = vadd.f32 %v1139_v50, %v1018_v35 }
 0xf0e   : > { %v1143_v53 = vmax.f32 %v1142_v52, 0.0 }
 0xf10   : > { %v1145_v54 = vpack.c.bf16 %v1143_v53, %v1143_v53 }
 0xf12   : > { %v1158_v55 = vsel %vm1156_vm4, %v1145_v54, 0 }
 0xf13   : > { %1519 = vmatpush3.bf16.msra.mxu1 %v1158_v55 }
 0xf16   : > { %1521 = vmatmul.mubr.msk.bf16.vlgmr.msra.gmra.mrb[24].mxu1 %vm1152_vm5, %v1144_v56 }
 0xfe9   : > { %v1194_v0 = vpop.f32.mrb[24].mxu1 }
 0xfea   : > { %v1195_v59 = vadd.f32 %v1194_v0, %v1150_v57  ;;  %v1522_v60 = vpop.f32.mrb[25].mxu1 }
 0xfeb   : > { %v1197_v61 = vpop.f32.mrb[26].mxu1 }
 0xfec   : > { %v1200_v62 = vmax.f32 %v1195_v59, 0.0  ;;  %v1523_v63 = vpop.f32.mrb[27].mxu1 }
 0xfee   : > { %v1202_v1 = vpack.c.bf16 %v1200_v62, %v1200_v62 }
 0xff0   : > { %v1213_v2 = vsel %vm1156_vm4, %v1202_v1, 0 }
 0xff1   : > { %1525 = vmatpush3.bf16.msra.mxu0 %v1213_v2 }
 0xff4   : > { %1527 = vmatmul.mubr.msk.bf16.vlgmr.msra.gmra.mrb[28].mxu0 %vm1152_vm5, %v1201_v3 }
0x10c7   : > { %v1249_v5 = vpop.f32.mrb[28].mxu0 }
0x10c8   : > { %v1250_v6 = vadd.f32 %v1249_v5, %v1207_v4  ;;  %v1528_v7 = vpop.f32.mrb[29].mxu0 }
0x10c9   : > { %v1252_v8 = vpop.f32.mrb[30].mxu0 }
0x10ca   : > { %v1255_v9 = vsel %vm335_vm1, %v1250_v6, -inf  ;;  %v1529_v10 = vpop.f32.mrb[31].mxu0 }
0x10cb   : > { %v1256_v11 = vrot.slane %v1255_v9, 4 }
0x10cd   : > { %v1257_v12 = vmax.f32 %v1255_v9, %v1256_v11 }
0x10cf   : > { %v1258_v13 = vrot.slane %v1257_v12, 2 }
0x10d1   : > { %v1259_v14 = vmax.f32 %v1257_v12, %v1258_v13 }
0x10d3   : > { %v1260_v15 = vrot.slane %v1259_v14, 1 }
0x10d5   : > { %v1261_v16 = vmax.f32 %v1259_v14, %v1260_v15 }
0x10d7   : > { %v1262_v17 = vsub.f32 %v1250_v6, %v1261_v16 }
0x10d9   : > { %v1263_v18 = vmul.f32 1.442695, %v1262_v17 }
0x10db   : > { %1619 = vpow2.f32 %v1263_v18 }
0x10e5   : > { %v1620_v19 = vpop.eup %1619 }
0x10e6   : > { %v1265_v20 = vsel %vm335_vm1, %v1620_v19, 0.0 }
0x10e7   : > { %v1266_v21 = vrot.slane %v1265_v20, 4 }
0x10e9   : > { %v1267_v22 = vadd.f32 %v1266_v21, %v1265_v20 }
0x10eb   : > { %v1268_v23 = vrot.slane %v1267_v22, 2 }
0x10ed   : > { %v1269_v24 = vadd.f32 %v1268_v23, %v1267_v22 }
0x10ef   : > { %v1270_v26 = vrot.slane %v1269_v24, 1 }
0x10f1   : > { %v1271_v27 = vadd.f32 %v1270_v26, %v1269_v24 }
0x10f3   : > { %1621 = vrcp.f32 %v1271_v27 }
0x10fd   : > { %v1622_v28 = vpop.eup %1621 }
0x10fe   : > { %v1273_v29 = vmul.f32 %v1622_v28, %v1620_v19 }
0x1100   : > { %1274 = vst [vmem:[%s323_s21] sm:$0xf] %v1273_v29 }
0x1101   : > { %1636 = shalt.err (!%p1633_p3)
}
0x1102   : > { %s1637_s14 = scalar_lea.hbm %s1973_s25, 64  ;;  %s1641_s21 = scalar_lea.hbm %s2024_s9, 128 }
0x1103   : > { %p1638_p4 = scmp.ne.s32.totalorder %s1973_s25, %s1637_s14  ;;  %p1642_p9 = scmp.lt.u32.totalorder %s1973_s25, %s2024_s9 }
0x1104   : > { %p1643_p10 = scmp.lt.u32.totalorder %s1641_s21, %s1637_s14  ;;  %p1645_p12 = scmp.lt.u32.totalorder %s1637_s14, %s1973_s25 }
0x1105   : > { %p1639_p7 = pnand %p1638_p4, %p1782_p5 }
0x1106   : > { %p1644_p11 = por %p1643_p10, %p1642_p9 }
0x1107   : > { %p1640_p8 = pneg %p1639_p7 }
0x1108   : > { %p1646_p13 = por %p1645_p12, %p1644_p11 }
0x110a   : > { %p1647_p0 = pnand %p1646_p13, %p1640_p8 }
0x110c   : > { %1650 = shalt.err (!%p1647_p0)
}
0x110d   : > { %1530 = dma.vmem_to_hbm [thread:$0]  (%p1782_p5), %s1975_s22, 64, %s1973_s25, %s1276_s27  }
0x110e PF: > { %p1536_p1 = scmp.ge.s32.totalorder %s1685_s12, 2  ;;  %s1301_s16 = sand.u32 1, %s1673_s30  }
0x110f   : > { %s1302_s13 = scalar_lea.sflag [#allocation3], %s1301_s16 }
0x1110   : > { %p1533_p2 = pnand %p1536_p1, %p1786_p6 }
0x1112   : > { %1668 = dma.done.wait (!%p1533_p2), %s1302_s13, 64  }
0x1113   : > { %1670 = vsyncadd (!%p1533_p2), %s1302_s13, 4294967232  ;;  %p19_p3 = scmp.ge.s32.totalorder %s1769_s15, 4   ;;  %s2029_s30 = smov %s1677_s10 }
0x1114   : > { %s2030_s10 = smov %s1681_s11  ;;  %s2031_s11 = smov %s1780_s18 }
0x1115   : > { %s2032_s12 = smov %s1769_s15  ;;  %21 = sbr.rel (!%p19_p3) target bundleno = 3 (0x3), region = 106 }
0x111c   :  { %1307 = vsyncpa [#allocation3], 1 }
0x111d   :  { %1309 = vsyncpa [#allocation3 + $0x1], 1 }

</bundles_post_ra>
